<compile_context>
chip_gen: v7x
topology: tpu7x:2x2x1
jax: 0.10.0
libtpu: 0.0.40
codegen_flags: <defaults>
</compile_context>

<pallas_src>
import jax
import jax.numpy as jnp
from jax.experimental import pallas as pl
from jax.experimental.pallas import tpu as pltpu

_SUBLANE = 8                      # f32 sublane width
_ROW_TILE = 1024                  # preferred row tile (amortizes ~0.35 us/step)
_SPLIT_MIN_ROWS = 64              # below this, one grid step is fine
_ROW_TILE_VMEM_BUDGET = 16 * 1024 * 1024   # for double-buffered row tiles


def _round_up(x, m):
    return ((x + m - 1) // m) * m


def _pick_row_tile(rows, k, n):
    """Row tile: large enough to amortize per-step overhead, >= 2 steps for
    v7x megacore when rows aren't tiny, capped so double-buffered x/out tiles
    stay well inside VMEM on every generation."""
    per_row_bytes = 2 * (k + n) * 4            # double-buffered x + out, f32
    cap = max(_SUBLANE,
              (_ROW_TILE_VMEM_BUDGET // per_row_bytes) // _SUBLANE * _SUBLANE)
    if rows >= 2 * _ROW_TILE:
        tm = _ROW_TILE
    elif rows > _SPLIT_MIN_ROWS:
        tm = _round_up((rows + 1) // 2, _SUBLANE)   # guarantee >= 2 grid steps
    else:
        tm = _round_up(rows, _SUBLANE)
    return max(_SUBLANE, min(tm, cap))


def _linear_kernel(x_ref, w_ref, b_ref, o_ref):
    # x_ref: [TM, K]   (row tile of activations)
    # w_ref: [K, N]    (resident across the grid; index_map returns (0, 0))
    # b_ref: [1, N]    (resident across the grid)
    # o_ref: [TM, N]
    acc = jnp.dot(x_ref[...], w_ref[...], preferred_element_type=jnp.float32)
    o_ref[...] = (acc + b_ref[...].astype(jnp.float32)).astype(o_ref.dtype)


def make_tag_head(weight, bias, use_bf16=False):
    """Build a TagHead forward fn with parameters prepared once.

    weight: [output_dim, 2*hidden_dim]  (PyTorch nn.Linear layout)
    bias:   [output_dim]
    Returns forward(output, hidden) -> [batch, seq, output_dim].
    """
    out_features, in_features = weight.shape

    # One-time parameter prep: pre-transpose to [K, N]; optional bf16 weights.
    param_dtype = jnp.bfloat16 if use_bf16 else jnp.asarray(weight).dtype
    w_t = jnp.asarray(weight).T.astype(param_dtype)              # [K, N]
    b2d = jnp.asarray(bias).reshape(1, out_features).astype(jnp.float32)

    # TODO(synk): if output_dim grows so large that the resident [K, N] weight
    # approaches ~20 MiB (v7x VMEM budget), add a second grid axis over N.

    def forward(output, hidden=None):
        del hidden  # unused, exactly like the PyTorch forward
        b, s, f = output.shape
        rows = b * s
        if rows == 0:  # empty batch/sequence guard
            return jnp.zeros((b, s, out_features), dtype=output.dtype)

        x2d = output.reshape(rows, f)
        if use_bf16:
            x2d = x2d.astype(jnp.bfloat16)

        tm = _pick_row_tile(rows, in_features, out_features)
        grid = (pl.cdiv(rows, tm),)

        # TODO(synk): for tiny rows (< a few thousand) a plain jnp.dot fallback
        # would beat pallas_call fixed overhead; kept the Pallas path here.
        out2d = pl.pallas_call(
            _linear_kernel,
            out_shape=jax.ShapeDtypeStruct((rows, out_features), output.dtype),
            grid_spec=pl.GridSpec(
                grid=grid,
                in_specs=[
                    pl.BlockSpec((tm, in_features), lambda i: (i, 0)),
                    pl.BlockSpec((in_features, out_features), lambda i: (0, 0)),
                    pl.BlockSpec((1, out_features), lambda i: (0, 0)),
                ],
                out_specs=pl.BlockSpec((tm, out_features), lambda i: (i, 0)),
            ),
            compiler_params=pltpu.CompilerParams(
                dimension_semantics=("parallel",),
            ),
        )(x2d, w_t, b2d)

        return out2d.reshape(b, s, out_features)

    return jax.jit(forward)


def tag_head_forward(output, hidden, weight, bias):
    """Convenience one-shot API.  Not for hot paths: it re-prepares params and
    re-jits on every call; use make_tag_head() once and reuse the result."""
    return make_tag_head(weight, bias)(output, hidden)


if __name__ == "__main__":
    key = jax.random.PRNGKey(0)
    k_out, k_h, k_w, k_b = jax.random.split(key, 4)

    batch, seq = 2, 8
    hidden_dim = 16
    in_features = hidden_dim * 2        # 32
    output_dim = 10

    # Encoder output (e.g. from a bidirectional LSTM): [batch, seq, 2*hidden]
    output = jax.random.normal(k_out, (batch, seq, in_features), dtype=jnp.float32)
    # `hidden` is ignored by the forward; construct something shape-plausible.
    hidden = jax.random.normal(k_h, (2, batch, hidden_dim), dtype=jnp.float32)

    # Deterministic parameter init matching nn.Linear shapes.
    bound = 1.0 / (in_features ** 0.5)
    weight = jax.random.uniform(k_w, (output_dim, in_features),
                                minval=-bound, maxval=bound, dtype=jnp.float32)
    bias = jax.random.uniform(k_b, (output_dim,),
                              minval=-bound, maxval=bound, dtype=jnp.float32)

    tag_head = make_tag_head(weight, bias)       # f32 path: bit-exact vs reference
    preds = tag_head(output, hidden)
    preds = jax.block_until_ready(preds)

    # Cross-check against plain-JAX reference.
    ref = output.reshape(-1, in_features) @ weight.T + bias
    ref = ref.reshape(batch, seq, output_dim)
    assert preds.shape == (batch, seq, output_dim)
    assert jnp.allclose(preds, ref, atol=1e-5, rtol=1e-5)

    print("KERNEL_OK")
</pallas_src>

<mosaic_0001>
module attributes {stable_mosaic.version = 11 : i64} {
  func.func @_linear_kernel(%arg0: i32, %arg1: memref<16x32xf32, #tpu.memory_space<vmem>>, %arg2: memref<32x10xf32, #tpu.memory_space<vmem>>, %arg3: memref<1x10xf32, #tpu.memory_space<vmem>>, %arg4: memref<16x10xf32, #tpu.memory_space<vmem>>) attributes {dimension_semantics = [#tpu.dimension_semantics<parallel>], iteration_bounds = array<i64: 1>, scalar_prefetch = 0 : i64, scratch_operands = 0 : i64, tpu.core_type = #tpu.core_type<tc>, window_params = [{transform_indices = @transform_0, window_bounds = array<i64: 16, 32>}, {pipeline_mode = #tpu.pipeline_mode<synchronous>, transform_indices = @transform_1, window_bounds = array<i64: 32, 10>}, {pipeline_mode = #tpu.pipeline_mode<synchronous>, transform_indices = @transform_2, window_bounds = array<i64: 1, 10>}, {transform_indices = @transform_3, window_bounds = array<i64: 16, 10>}]} {
    %c0 = arith.constant 0 : index
    %c0_0 = arith.constant 0 : index
    %0 = vector.load %arg1[%c0, %c0_0] : memref<16x32xf32, #tpu.memory_space<vmem>>, vector<16x32xf32>
    %c0_1 = arith.constant 0 : index
    %c0_2 = arith.constant 0 : index
    %1 = vector.load %arg2[%c0_1, %c0_2] : memref<32x10xf32, #tpu.memory_space<vmem>>, vector<32x10xf32>
    %cst = arith.constant dense<0.000000e+00> : vector<16x10xf32>
    %2 = tpu.matmul %0, %1, %cst {dimension_numbers = #tpu.dot_dimension_numbers<[1], [0], [0], [1], [0, 0, 1, 1], [], []>} : vector<16x32xf32>, vector<32x10xf32>, vector<16x10xf32> -> vector<16x10xf32>
    %c0_3 = arith.constant 0 : index
    %c0_4 = arith.constant 0 : index
    %3 = vector.load %arg3[%c0_3, %c0_4] : memref<1x10xf32, #tpu.memory_space<vmem>>, vector<1x10xf32>
    %4 = vector.broadcast %3 : vector<1x10xf32> to vector<16x10xf32>
    %5 = arith.addf %2, %4 : vector<16x10xf32>
    %c0_5 = arith.constant 0 : index
    %c0_6 = arith.constant 0 : index
    %6 = vector.load %arg4[%c0_5, %c0_6] : memref<16x10xf32, #tpu.memory_space<vmem>>, vector<16x10xf32>
    tpu.vector_store %arg4[%c0_5, %c0_6], %5 {strides = array<i32>} : memref<16x10xf32, #tpu.memory_space<vmem>>, vector<16x10xf32>,
    return
  }
  func.func @transform_0(%arg0: i32) -> (i32, i32) {
    %c0_i32 = arith.constant 0 : i32
    %c0_i32_0 = arith.constant 0 : i32
    return %arg0, %c0_i32 : i32, i32
  }
  func.func @transform_1(%arg0: i32) -> (i32, i32) {
    %c0_i32 = arith.constant 0 : i32
    %c0_i32_0 = arith.constant 0 : i32
    %c0_i32_1 = arith.constant 0 : i32
    return %c0_i32, %c0_i32_0 : i32, i32
  }
  func.func @transform_2(%arg0: i32) -> (i32, i32) {
    %c0_i32 = arith.constant 0 : i32
    %c0_i32_0 = arith.constant 0 : i32
    %c0_i32_1 = arith.constant 0 : i32
    return %c0_i32, %c0_i32_0 : i32, i32
  }
  func.func @transform_3(%arg0: i32) -> (i32, i32) {
    %c0_i32 = arith.constant 0 : i32
    %c0_i32_0 = arith.constant 0 : i32
    return %arg0, %c0_i32 : i32, i32
  }
}

</mosaic_0001>

<bundles_post_ra>
// kernel: forward.1
= control target key start
LH: loop header
LB: loop body
LE: loop exit
PB: predicated region body
PF: predicated region fallthrough
CT: control target
= control target key end

     0   :  { %8 = vsyncpa [#allocation3], 0  ;;  %s337_s0 = inlined_call_operand.hbm [shape: f32[16,32], index: 0, kind: input, shape index: {}]   ;;  %s338_s1 = inlined_call_operand.hbm [shape: f32[32,10], index: 1, kind: input, shape index: {}]   ;;  %s339_s2 = inlined_call_operand.vmem [shape: f32[1,10], index: 2, kind: input, shape index: {}]   ;;  %s340_s3 = inlined_call_operand.hbm [shape: f32[16,10], index: 3, kind: output, shape index: {}]  }
   0x1   :  { %9 = vsyncpa [#allocation6], 0 }
   0x2   :  { %10 = vsyncpa [#allocation4], 0  ;;  %s264_s12 = smov [#allocation2]   ;;  %s192_s16 = scalar_lea.hbm %s337_s0, 256 }
   0x3   :  { %s16_s13 = sshll.u32 %s264_s12, 4  ;;  %p193_p0 = scmp.ne.s32.totalorder %s337_s0, %s192_s16  ;;  %s17_s13 = int_to_ptr.vmem [resolvable:$true] %s16_s13 }
   0x4   :  { %p196_p1 = scmp.lt.u32.totalorder %s192_s16, %s337_s0 }
   0x6   :  { %p198_p2 = pnand %p196_p1, %p193_p0 }
   0x8   :  { %201 = shalt.err (!%p198_p2)
}
   0x9   :  { %s202_s21 = scalar_lea.vmem %s17_s13, 256  ;;  %p207_p4 = scmp.lt.s32.totalorder %s17_s13, %s17_s13 }
   0xa   :  { %p203_p3 = scmp.ne.s32.totalorder %s17_s13, %s202_s21  ;;  %p208_p5 = scmp.lt.s32.totalorder %s202_s21, %s202_s21 }
   0xc   :  { %p209_p6 = por %p208_p5, %p207_p4 }
   0xe   :  { %p210_p7 = pnand %p209_p6, %p203_p3 }
  0x10   :  { %213 = shalt.err (!%p210_p7)
}
  0x11   :  { %s265_s22 = smov 128   ;;  %s266_s23 = smov 8  }
  0x12   :  { %22 = dma.hbm_to_vmem [thread:$0]  %s337_s0, 256, %s17_s13, [#allocation3], %s265_s22, %s265_s22, %s266_s23  }
  0x13   :  { %s267_s26 = smov [#allocation5]   ;;  %s214_s30 = scalar_lea.hbm %s338_s1, 512 }
  0x14   :  { %s28_s27 = sshll.u32 %s267_s26, 4  ;;  %p215_p8 = scmp.ne.s32.totalorder %s338_s1, %s214_s30  ;;  %s29_s27 = int_to_ptr.vmem [resolvable:$true] %s28_s27 }
  0x15   :  { %p218_p9 = scmp.lt.u32.totalorder %s214_s30, %s338_s1 }
  0x17   :  { %p220_p10 = pnand %p218_p9, %p215_p8 }
  0x19   :  { %223 = shalt.err (!%p220_p10)
}
  0x1a   :  { %s224_s8 = scalar_lea.vmem %s29_s27, 512  ;;  %p229_p12 = scmp.lt.s32.totalorder %s29_s27, %s29_s27 }
  0x1b   :  { %p225_p11 = scmp.ne.s32.totalorder %s29_s27, %s224_s8  ;;  %p230_p13 = scmp.lt.s32.totalorder %s224_s8, %s224_s8 }
  0x1d   :  { %p231_p0 = por %p230_p13, %p229_p12 }
  0x1f   :  { %p232_p1 = pnand %p231_p0, %p225_p11 }
  0x21   :  { %235 = shalt.err (!%p232_p1)
}
  0x22   :  { %34 = dma.hbm_to_vmem [thread:$0]  %s338_s1, 512, %s29_s27, [#allocation6], %s265_s22, %s265_s22, %s266_s23  }
  0x23   :  { %258 = dma.done.wait [#allocation3], 256  }
  0x24   :  { %259 = vsyncadd [#allocation3], 4294967040 }
  0x25   :  { %260 = dma.done.wait [#allocation6], 512  }
  0x26   :  { %261 = vsyncadd [#allocation6], 4294966784  ;;  %vm56_vm0 = vcmask 261120   ;;  %v45_v0 = vld [vmem:[#allocation5] sm:$0xff]  ;;  %v46_v1 = vld [vmem:[#allocation5 + $0x8] sm:$0xff]  ;;  %s268_s11 = smov [#allocation7]  }
  0x27   :  { %v47_v2 = vld [vmem:[#allocation5 + $0x10] sm:$0xff]  ;;  %v179_v3 = vpack.c.bf16 %v46_v1, %v45_v0  ;;  %v48_v4 = vld [vmem:[#allocation5 + $0x18] sm:$0xff]  ;;  %s146_s12 = sshll.u32 %s268_s11, 4  ;;  %vm138_vm1 = vcmask 80896   ;;  %s147_s12 = int_to_ptr.vmem [resolvable:$true] %s146_s12 }
  0x28   :  { %v43_v5 = vld [vmem:[#allocation2] sm:$0xff]  ;;  %v183_v6 = vpack.c.bf16 %v48_v4, %v47_v2  ;;  %v44_v7 = vld [vmem:[#allocation2 + $0x8] sm:$0xff]  ;;  %s236_s13 = scalar_lea.vmem %s147_s12, 256  ;;  %p241_p3 = scmp.lt.s32.totalorder %s147_s12, %s147_s12 }
  0x29   :  { %176 = vmatprep.mubr.msk.f32.mxu0 %vm56_vm0, %v43_v5  ;;  %180 = vmatprep.subr.bf16.mxu0 %v179_v3  ;;  %v159_v8 = vld [vmem:[%s339_s2] ss:$0 sm:$0xff]  ;;  %p237_p2 = scmp.ne.s32.totalorder %s147_s12, %s236_s13  ;;  %p242_p4 = scmp.lt.s32.totalorder %s236_s13, %s236_s13 }
  0x2a   :  { %182 = vmatpush3.bf16.msra.mxu0 %v179_v3 }
  0x2b   :  { %184 = vmatprep.subr.bf16.mxu0 %v183_v6  ;;  %p243_p5 = por %p242_p4, %p241_p3 }
  0x2d   :  { %p244_p6 = pnand %p243_p5, %p237_p2 }
  0x2e   :  { %186 = vmatpush3.bf16.msra.mxu0 %v183_v6 }
  0x31   :  { %177 = vmatmul.mubr.msk.f32.vlgmr.msra.gmra.mrb[0].mxu0 %vm56_vm0, %v44_v7 }
 0x104   :  { %v178_v9 = vpop.f32.mrb[0].mxu0 }
 0x105   :  { %v135_v10 = vadd.f32 %v178_v9, %v159_v8  ;;  %v129_v11 = vpop.f32.mrb[1].mxu0 }
 0x106   :  { %v130_v12 = vadd.f32 %v159_v8, %v129_v11 }
 0x107   :  { %140 = vst.msk [vmem:[#allocation7 + $0x8] sm:$0xff] %vm138_vm1, %v135_v10 }
 0x108   :  { %139 = vst.msk [vmem:[#allocation7] sm:$0xff] %vm138_vm1, %v130_v12 }
 0x109   :  { %247 = shalt.err (!%p244_p6)
}
 0x10a   :  { %s248_s2 = scalar_lea.hbm %s340_s3, 256 }
 0x10b   :  { %p249_p7 = scmp.ne.s32.totalorder %s340_s3, %s248_s2  ;;  %p252_p8 = scmp.lt.u32.totalorder %s248_s2, %s340_s3 }
 0x10d   :  { %p254_p9 = pnand %p252_p8, %p249_p7 }
 0x10f   :  { %257 = shalt.err (!%p254_p9)
}
 0x110   :  { %152 = dma.vmem_to_hbm [thread:$0]  %s147_s12, 256, %s340_s3, [#allocation4], %s265_s22, %s265_s22, %s266_s23  }
 0x111   :  { %262 = dma.done.wait [#allocation4], 256  }
 0x112   :  { %263 = vsyncadd [#allocation4], 4294967040 }
 0x113   :  { %156 = vsyncpa [#allocation3], 1 }
 0x114   :  { %157 = vsyncpa [#allocation6], 1 }
 0x115   :  { %158 = vsyncpa [#allocation4], 1 }

</bundles_post_ra>
